<compile_context>
chip_gen: v6e
topology: v6e:2x2x1
jax: 0.10.0
libtpu: 0.0.40
codegen_flags: <defaults>
</compile_context>

<pallas_src>
import functools

import jax
import jax.numpy as jnp
from jax.experimental import pallas as pl
from jax.experimental.pallas import tpu as pltpu


def _out_conv_kernel(x_ref, w_ref, b_ref, o_ref, *, chunk):
    """One grid step of the 1x1 conv.

    x_ref: (bn, C_in,  T)  VMEM tile (lane axis = flattened spatial)
    w_ref: (C_out, C_in)   SMEM (scalar reads)
    b_ref: (C_out,)        SMEM (scalar reads)
    o_ref: (bn, C_out, T)  VMEM tile
    """
    c_out, c_in = w_ref.shape
    bn, _, t = x_ref.shape
    n_chunks = t // chunk  # wrapper guarantees chunk | T

    # Iterate pages x lane-chunks so the live register set stays at a few
    # vregs regardless of how big the DMA'd block is (no full-tile hoist).
    @pl.loop(0, bn)
    def _page(b):
        page = pl.ds(b, 1)

        @pl.loop(0, n_chunks)
        def _lane_chunk(s):
            off = pl.multiple_of(s * chunk, chunk)
            lanes = pl.ds(off, chunk)

            # Load each input channel chunk once; reuse across output rows.
            xs = [
                x_ref[page, ci:ci + 1, lanes].astype(jnp.float32)
                for ci in range(c_in)
            ]
            rows = []
            for co in range(c_out):  # tiny static loops -> VPU scalar FMAs
                acc = xs[0] * w_ref[co, 0]
                for ci in range(1, c_in):
                    acc = acc + xs[ci] * w_ref[co, ci]
                rows.append(acc + b_ref[co])

            # Single dense store of all C_out rows for this chunk.
            o_ref[page, :, lanes] = jnp.concatenate(rows, axis=1).astype(o_ref.dtype)

    # TODO(synk): for large C_in/C_out configurations, switch to a tiled MXU
    # matmul with a K grid axis + f32 accumulator instead of VPU FMAs.


def out_conv(x_nchw, weight, bias, *,
             target_step_bytes=8 * 1024 * 1024,
             max_lanes=256 * 1024,
             chunk=512):
    """1x1 conv with bias.

    x_nchw: (N, C_in, H, W)
    weight: (C_out, C_in) or Conv2d's (C_out, C_in, 1, 1)
    bias:   (C_out,)
    returns (N, C_out, H, W)
    """
    n, c_in, h, w = x_nchw.shape
    c_out = weight.shape[0]
    hw = h * w

    # (N, C, H, W) -> (N, C, H*W): free, contiguous reshape. No jnp.pad and no
    # output slice: any ragged spatial tail is handled by Pallas block masking.
    x3 = x_nchw.reshape(n, c_in, hw)

    # Weights/bias as 32-bit scalars in SMEM.
    w_f32 = weight.reshape(c_out, c_in).astype(jnp.float32)
    b_f32 = bias.reshape(c_out).astype(jnp.float32)

    # ---- Tile sizing ------------------------------------------------------
    lane = 128
    # In-kernel lane chunk: multiple of 128, no larger than the (rounded-up)
    # spatial extent so tiny images don't over-allocate.
    chunk = max(lane, min(chunk, pl.cdiv(hw, lane) * lane))
    # Spatial block: multiple of `chunk` (so the in-kernel loop divides it
    # exactly), capped at max_lanes (rounded down to a chunk multiple).
    cap = max(chunk, (max_lanes // chunk) * chunk)
    t_hw = min(pl.cdiv(hw, chunk) * chunk, cap)
    # With N == 1 the batch axis gives no parallelism: keep >=2 spatial steps
    # (v7x has 2 TensorCores) when the image is large enough to split.
    if n == 1 and t_hw > chunk and pl.cdiv(hw, t_hw) == 1:
        t_hw = pl.cdiv(pl.cdiv(hw, 2), chunk) * chunk
    g_hw = pl.cdiv(hw, t_hw)

    # Batch block: grow until one grid step moves ~target_step_bytes of HBM
    # traffic (in + out), but keep >=2 grid steps when possible so both
    # TensorCores get work on v7x.
    itemsize = jnp.dtype(x_nchw.dtype).itemsize
    step_bytes_per_batch = (c_in + c_out) * t_hw * itemsize
    desired_bn = max(1, int(target_step_bytes // step_bytes_per_batch))
    if g_hw == 1 and n > 1:
        desired_bn = min(desired_bn, n // 2)
    desired_bn = max(1, min(desired_bn, n))
    # Largest divisor of N not exceeding desired_bn (keeps batch blocks exact).
    bn = max(d for d in range(1, desired_bn + 1) if n % d == 0)
    g_n = n // bn

    kernel = functools.partial(_out_conv_kernel, chunk=chunk)

    out3 = pl.pallas_call(
        kernel,
        out_shape=jax.ShapeDtypeStruct((n, c_out, hw), x_nchw.dtype),
        grid_spec=pltpu.PrefetchScalarGridSpec(
            num_scalar_prefetch=0,
            grid=(g_n, g_hw),
            in_specs=[
                pl.BlockSpec((bn, c_in, t_hw), lambda i, j: (i, 0, j)),
                pl.BlockSpec(memory_space=pltpu.MemorySpace.SMEM),
                pl.BlockSpec(memory_space=pltpu.MemorySpace.SMEM),
            ],
            out_specs=pl.BlockSpec((bn, c_out, t_hw), lambda i, j: (i, 0, j)),
        ),
        compiler_params=pltpu.CompilerParams(
            dimension_semantics=("parallel", "parallel"),
            # Headroom for double-buffered multi-MB blocks (v5e's scoped
            # default is only ~16 MiB; 32 MiB is safe on v5e/v6e/v7x).
            vmem_limit_bytes=32 * 1024 * 1024,
        ),
    )(x3, w_f32, b_f32)

    # Free, contiguous reshape back to (N, C_out, H, W) — no slicing needed.
    return out3.reshape(n, c_out, h, w)


if __name__ == "__main__":
    key = jax.random.PRNGKey(0)
    k_x, k_w, k_b = jax.random.split(key, 3)

    batch, in_channels, height, width = 2, 4, 16, 16
    num_classes = 3

    x = jax.random.normal(k_x, (batch, in_channels, height, width), jnp.float32)
    # nn.Conv2d(in_channels, num_classes, kernel_size=1, bias=True) parameters.
    weight = jax.random.normal(
        k_w, (num_classes, in_channels, 1, 1), jnp.float32) * 0.1
    bias = jax.random.normal(k_b, (num_classes,), jnp.float32) * 0.1

    y = out_conv(x, weight, bias)
    y = jax.block_until_ready(y)

    # Reference in plain JAX (channel contraction + bias broadcast).
    y_ref = (jnp.einsum("oi,nihw->nohw", weight[:, :, 0, 0], x)
             + bias[None, :, None, None])
    assert y.shape == (batch, num_classes, height, width)
    assert jnp.allclose(y, y_ref, atol=1e-5, rtol=1e-5)

    print("KERNEL_OK")
</pallas_src>

<mosaic_0001>
module attributes {stable_mosaic.version = 11 : i64} {
  func.func @_out_conv_kernel(%arg0: i32, %arg1: i32, %arg2: memref<1x4x256xf32, #tpu.memory_space<vmem>>, %arg3: memref<3x4xf32, #tpu.memory_space<smem>>, %arg4: memref<3xf32, #tpu.memory_space<smem>>, %arg5: memref<1x3x256xf32, #tpu.memory_space<vmem>>) attributes {dimension_semantics = [#tpu.dimension_semantics<parallel>, #tpu.dimension_semantics<parallel>], iteration_bounds = array<i64: 2, 1>, scalar_prefetch = 0 : i64, scratch_operands = 0 : i64, tpu.core_type = #tpu.core_type<tc>, window_params = [{transform_indices = @transform_0, window_bounds = array<i64: 1, 4, 256>}, {transform_indices = @transform_1, window_bounds = array<i64: 3, 4>}, {transform_indices = @transform_2, window_bounds = array<i64: 3>}, {transform_indices = @transform_3, window_bounds = array<i64: 1, 3, 256>}]} {
    %c0_i32 = arith.constant 0 : i32
    %c1_i32 = arith.constant 1 : i32
    %0 = arith.muli %c0_i32, %c1_i32 : i32
    %c0_i32_0 = arith.constant 0 : i32
    %1 = arith.addi %c0_i32_0, %0 : i32
    %c0_i32_1 = arith.constant 0 : i32
    %c1_i32_2 = arith.constant 1 : i32
    %2 = arith.muli %c0_i32_1, %c1_i32_2 : i32
    %c0_i32_3 = arith.constant 0 : i32
    %3 = arith.addi %c0_i32_3, %2 : i32
    %c256_i32 = arith.constant 256 : i32
    %4 = arith.muli %3, %c256_i32 : i32
    %5 = tpu.assume_multiple %4, 256 : i32
    %6 = arith.index_cast %1 : i32 to index
    %c0 = arith.constant 0 : index
    %7 = arith.index_cast %5 : i32 to index
    %8 = vector.load %arg2[%6, %c0, %7] : memref<1x4x256xf32, #tpu.memory_space<vmem>>, vector<1x1x256xf32>
    %9 = arith.index_cast %1 : i32 to index
    %c1 = arith.constant 1 : index
    %10 = arith.index_cast %5 : i32 to index
    %11 = vector.load %arg2[%9, %c1, %10] : memref<1x4x256xf32, #tpu.memory_space<vmem>>, vector<1x1x256xf32>
    %12 = arith.index_cast %1 : i32 to index
    %c2 = arith.constant 2 : index
    %13 = arith.index_cast %5 : i32 to index
    %14 = vector.load %arg2[%12, %c2, %13] : memref<1x4x256xf32, #tpu.memory_space<vmem>>, vector<1x1x256xf32>
    %15 = arith.index_cast %1 : i32 to index
    %c3 = arith.constant 3 : index
    %16 = arith.index_cast %5 : i32 to index
    %17 = vector.load %arg2[%15, %c3, %16] : memref<1x4x256xf32, #tpu.memory_space<vmem>>, vector<1x1x256xf32>
    %c0_4 = arith.constant 0 : index
    %c0_5 = arith.constant 0 : index
    %18 = memref.load %arg3[%c0_4, %c0_5] : memref<3x4xf32, #tpu.memory_space<smem>>
    %19 = vector.broadcast %18 : f32 to vector<1x1x256xf32>
    %20 = arith.mulf %8, %19 : vector<1x1x256xf32>
    %c0_6 = arith.constant 0 : index
    %c1_7 = arith.constant 1 : index
    %21 = memref.load %arg3[%c0_6, %c1_7] : memref<3x4xf32, #tpu.memory_space<smem>>
    %22 = vector.broadcast %21 : f32 to vector<1x1x256xf32>
    %23 = arith.mulf %11, %22 : vector<1x1x256xf32>
    %24 = arith.addf %20, %23 : vector<1x1x256xf32>
    %c0_8 = arith.constant 0 : index
    %c2_9 = arith.constant 2 : index
    %25 = memref.load %arg3[%c0_8, %c2_9] : memref<3x4xf32, #tpu.memory_space<smem>>
    %26 = vector.broadcast %25 : f32 to vector<1x1x256xf32>
    %27 = arith.mulf %14, %26 : vector<1x1x256xf32>
    %28 = arith.addf %24, %27 : vector<1x1x256xf32>
    %c0_10 = arith.constant 0 : index
    %c3_11 = arith.constant 3 : index
    %29 = memref.load %arg3[%c0_10, %c3_11] : memref<3x4xf32, #tpu.memory_space<smem>>
    %30 = vector.broadcast %29 : f32 to vector<1x1x256xf32>
    %31 = arith.mulf %17, %30 : vector<1x1x256xf32>
    %32 = arith.addf %28, %31 : vector<1x1x256xf32>
    %c0_12 = arith.constant 0 : index
    %33 = memref.load %arg4[%c0_12] : memref<3xf32, #tpu.memory_space<smem>>
    %34 = vector.broadcast %33 : f32 to vector<1x1x256xf32>
    %35 = arith.addf %32, %34 : vector<1x1x256xf32>
    %c1_13 = arith.constant 1 : index
    %c0_14 = arith.constant 0 : index
    %36 = memref.load %arg3[%c1_13, %c0_14] : memref<3x4xf32, #tpu.memory_space<smem>>
    %37 = vector.broadcast %36 : f32 to vector<1x1x256xf32>
    %38 = arith.mulf %8, %37 : vector<1x1x256xf32>
    %c1_15 = arith.constant 1 : index
    %c1_16 = arith.constant 1 : index
    %39 = memref.load %arg3[%c1_15, %c1_16] : memref<3x4xf32, #tpu.memory_space<smem>>
    %40 = vector.broadcast %39 : f32 to vector<1x1x256xf32>
    %41 = arith.mulf %11, %40 : vector<1x1x256xf32>
    %42 = arith.addf %38, %41 : vector<1x1x256xf32>
    %c1_17 = arith.constant 1 : index
    %c2_18 = arith.constant 2 : index
    %43 = memref.load %arg3[%c1_17, %c2_18] : memref<3x4xf32, #tpu.memory_space<smem>>
    %44 = vector.broadcast %43 : f32 to vector<1x1x256xf32>
    %45 = arith.mulf %14, %44 : vector<1x1x256xf32>
    %46 = arith.addf %42, %45 : vector<1x1x256xf32>
    %c1_19 = arith.constant 1 : index
    %c3_20 = arith.constant 3 : index
    %47 = memref.load %arg3[%c1_19, %c3_20] : memref<3x4xf32, #tpu.memory_space<smem>>
    %48 = vector.broadcast %47 : f32 to vector<1x1x256xf32>
    %49 = arith.mulf %17, %48 : vector<1x1x256xf32>
    %50 = arith.addf %46, %49 : vector<1x1x256xf32>
    %c1_21 = arith.constant 1 : index
    %51 = memref.load %arg4[%c1_21] : memref<3xf32, #tpu.memory_space<smem>>
    %52 = vector.broadcast %51 : f32 to vector<1x1x256xf32>
    %53 = arith.addf %50, %52 : vector<1x1x256xf32>
    %c2_22 = arith.constant 2 : index
    %c0_23 = arith.constant 0 : index
    %54 = memref.load %arg3[%c2_22, %c0_23] : memref<3x4xf32, #tpu.memory_space<smem>>
    %55 = vector.broadcast %54 : f32 to vector<1x1x256xf32>
    %56 = arith.mulf %8, %55 : vector<1x1x256xf32>
    %c2_24 = arith.constant 2 : index
    %c1_25 = arith.constant 1 : index
    %57 = memref.load %arg3[%c2_24, %c1_25] : memref<3x4xf32, #tpu.memory_space<smem>>
    %58 = vector.broadcast %57 : f32 to vector<1x1x256xf32>
    %59 = arith.mulf %11, %58 : vector<1x1x256xf32>
    %60 = arith.addf %56, %59 : vector<1x1x256xf32>
    %c2_26 = arith.constant 2 : index
    %c2_27 = arith.constant 2 : index
    %61 = memref.load %arg3[%c2_26, %c2_27] : memref<3x4xf32, #tpu.memory_space<smem>>
    %62 = vector.broadcast %61 : f32 to vector<1x1x256xf32>
    %63 = arith.mulf %14, %62 : vector<1x1x256xf32>
    %64 = arith.addf %60, %63 : vector<1x1x256xf32>
    %c2_28 = arith.constant 2 : index
    %c3_29 = arith.constant 3 : index
    %65 = memref.load %arg3[%c2_28, %c3_29] : memref<3x4xf32, #tpu.memory_space<smem>>
    %66 = vector.broadcast %65 : f32 to vector<1x1x256xf32>
    %67 = arith.mulf %17, %66 : vector<1x1x256xf32>
    %68 = arith.addf %64, %67 : vector<1x1x256xf32>
    %c2_30 = arith.constant 2 : index
    %69 = memref.load %arg4[%c2_30] : memref<3xf32, #tpu.memory_space<smem>>
    %70 = vector.broadcast %69 : f32 to vector<1x1x256xf32>
    %71 = arith.addf %68, %70 : vector<1x1x256xf32>
    %72 = tpu.concatenate %35, %53, %71 in 1 : vector<1x1x256xf32>, vector<1x1x256xf32>, vector<1x1x256xf32> -> vector<1x3x256xf32>
    %73 = arith.index_cast %1 : i32 to index
    %c0_31 = arith.constant 0 : index
    %74 = arith.index_cast %5 : i32 to index
    %75 = vector.load %arg5[%73, %c0_31, %74] : memref<1x3x256xf32, #tpu.memory_space<vmem>>, vector<1x3x256xf32>
    tpu.vector_store %arg5[%73, %c0_31, %74], %72 {strides = array<i32>} : memref<1x3x256xf32, #tpu.memory_space<vmem>>, vector<1x3x256xf32>,
    %c1_i32_32 = arith.constant 1 : i32
    %c1_i32_33 = arith.constant 1 : i32
    return
  }
  func.func @transform_0(%arg0: i32, %arg1: i32) -> (i32, i32, i32) {
    %c0_i32 = arith.constant 0 : i32
    %c0_i32_0 = arith.constant 0 : i32
    return %arg0, %c0_i32, %arg1 : i32, i32, i32
  }
  func.func @transform_1(%arg0: i32, %arg1: i32) -> (i32, i32) {
    %c0_i32 = arith.constant 0 : i32
    %c0_i32_0 = arith.constant 0 : i32
    %c0_i32_1 = arith.constant 0 : i32
    return %c0_i32, %c0_i32_0 : i32, i32
  }
  func.func @transform_2(%arg0: i32, %arg1: i32) -> i32 {
    %c0_i32 = arith.constant 0 : i32
    %c0_i32_0 = arith.constant 0 : i32
    return %c0_i32 : i32
  }
  func.func @transform_3(%arg0: i32, %arg1: i32) -> (i32, i32, i32) {
    %c0_i32 = arith.constant 0 : i32
    %c0_i32_0 = arith.constant 0 : i32
    return %arg0, %c0_i32, %arg1 : i32, i32, i32
  }
}

</mosaic_0001>

<bundles_post_ra>
// kernel: tpu_custom_call.1
= control target key start
LH: loop header
LB: loop body
LE: loop exit
PB: predicated region body
PF: predicated region fallthrough
CT: control target
= control target key end

     0   :  { %8 = vsyncpa [#allocation3], 0  ;;  %s856_s0 = inlined_call_operand.hbm [shape: f32[2,4,256], index: 0, kind: input, shape index: {}]   ;;  %s857_s1 = inlined_call_operand.hbm [shape: f32[3,4], index: 1, kind: input, shape index: {}]   ;;  %s858_s2 = inlined_call_operand.vmem [shape: f32[3], index: 2, kind: input, shape index: {}]   ;;  %s859_s3 = inlined_call_operand.vmem [shape: f32[2,3,256], index: 3, kind: output, shape index: {}]  }
   0x1   :  { %10 = vsyncpa [#allocation3 + $0x1], 0 }
   0x2   :  { %11 = vsyncpa [#allocation4], 0 }
   0x3   :  { %12 = vsyncpa [#allocation5], 0  ;;  %s714_s12 = smov 0   ;;  %s716_s13 = smov 0  }
   0x4   :  { %s718_s14 = smov 0   ;;  %s720_s15 = smov 0  }
   0x5   :  { %s722_s16 = smov 0   ;;  %s724_s17 = smov 0  }
   0x6 LB: > { %s466_s18 = sadd.s32 4294967295, %s689_s17   ;;  %p52_p0 = scmp.ne.s32.totalorder %s673_s13, %s669_s12  ;;  %s689_s17 = sphi %s724_s17, %s18_s17   ;;  %s685_s16 = sphi %s722_s16, %s870_s16   ;;  %s681_s15 = sphi %s720_s15, %s869_s15   ;;  %s677_s14 = sphi %s718_s14, %s868_s14   ;;  %s673_s13 = sphi %s716_s13, %s867_s13   ;;  %s669_s12 = sphi %s714_s12, %s866_s12  }
   0x7   : > { %p744_p1 = scmp.eq.s32.totalorder %s466_s18, 0  ;;  %p468_p2 = scmp.ge.s32.totalorder %s689_s17, 1 }
   0x8   : > { %p133_p3 = scmp.lt.s32.totalorder %s689_s17, 3  ;;  %s155_s24 = sshll.u32 %s858_s2, 4  ;;  %s156_s24 = int_to_ptr.vmem [resolvable:$true] %s155_s24 }
   0x9   : > { %p752_p4 = por %p744_p1, %p52_p0  ;;  %s30_s26 = sadd.s32 1, %s685_s16 }
   0xa   : > { %p756_p5 = pnand %p468_p2, %p133_p3  ;;  %p772_p8 = scmp.ge.s32.totalorder %s30_s26, 2 }
   0xb   : > { %s691_s28 = smov [#allocation6]   ;;  %s588_s4 = scalar_lea.vmem %s156_s24, 16 }
   0xc   : > { %p511_p6 = pneg %p756_p5  ;;  %p589_p9 = scmp.ne.s32.totalorder %s156_s24, %s588_s4 }
   0xd   : > { %p596_p13 = scmp.lt.s32.totalorder %s156_s24, %s156_s24  ;;  %p597_p0 = scmp.lt.s32.totalorder %s588_s4, %s588_s4 }
   0xe   : > { %p767_p7 = pnand %p511_p6, %p744_p1 }
   0xf   : > { %p598_p2 = por %p597_p0, %p596_p13 }
  0x10   : > { %514 = dma.hbm_to_smem (!%p767_p7), %s857_s1, 64, %s691_s28, [#allocation4]  }
  0x11   : > { %p590_p10 = pneg %p767_p7 }
  0x13   : > { %p591_p11 = pnand %p590_p10, %p589_p9 }
  0x15   : > { %p592_p12 = pneg %p591_p11 }
  0x17   : > { %p599_p3 = pnand %p598_p2, %p592_p12 }
  0x19   : > { %602 = shalt.err (!%p599_p3)
}
  0x1a   : > { %s692_s5 = smov [#allocation7]   ;;  %s872_s26 = smov (%p772_p8, %s30_s26), 0 }
  0x1b   : > { %517 = dma.vmem_to_smem (!%p767_p7), %s156_s24, 16, %s692_s5, [#allocation5]  }
  0x1c   : > { %s39_s6 = sadd.s32 1, %s677_s14  ;;  %p46_p6 = scmp.ne.s32.totalorder %s677_s14, %s673_s13 }
  0x1d   : > { %s34_s7 = ssub.s32 %s685_s16, %s872_s26  ;;  %p47_p9 = scmp.eq.s32.totalorder %s689_s17, 0 }
  0x1e   : > { %p37_p10 = scmp.eq.s32.totalorder %s34_s7, 0  ;;  %p524_p11 = scmp.lt.s32.totalorder %s689_s17, 2 }
  0x1f   : > { %p48_p12 = por %p47_p9, %p46_p6  ;;  %s166_s8 = sand.u32 1, %s677_s14  }
  0x20   : > { %s798_s9 = scalar_select %p37_p10, %s677_s14, %s39_s6  }
  0x21   : > { %s472_s10 = sshll.u32 %s166_s8, 3  ;;  %s499_s11 = sshll.u32 %s685_s16, 7 }
  0x22   : > { %s178_s22 = scalar_lea.hbm %s856_s0, %s499_s11  ;;  %s170_s23 = scalar_lea.vmem [#allocation2], %s472_s10 }
  0x23   : > { %s180_s24 = sshll.u32 %s170_s23, 4  ;;  %p804_p7 = pnand %p524_p11, %p48_p12  ;;  %s181_s24 = int_to_ptr.vmem [resolvable:$true] %s180_s24 }
  0x24   : > { %s167_s27 = scalar_lea.sflag [#allocation3], %s166_s8  ;;  %s616_s28 = scalar_lea.vmem %s181_s24, 128 }
  0x25   : > { %p605_p8 = pneg %p804_p7  ;;  %p617_p13 = scmp.ne.s32.totalorder %s181_s24, %s616_s28 }
  0x26   : > { %s693_s29 = smov [#allocation2]  }
  0x27   : > { %p619_p0 = pnand %p617_p13, %p605_p8  ;;  %s621_s30 = sshll.u32 %s693_s29, 4  ;;  %s622_s30 = int_to_ptr.vmem [resolvable:$false] %s621_s30 }
  0x28   : > { %s623_s4 = scalar_lea.vmem %s622_s30, 256  ;;  %p624_p3 = scmp.lt.s32.totalorder %s181_s24, %s622_s30 }
  0x29   : > { %p620_p2 = pneg %p619_p0  ;;  %p625_p6 = scmp.lt.s32.totalorder %s623_s4, %s616_s28 }
  0x2b   : > { %p626_p9 = por %p625_p6, %p624_p3 }
  0x2d   : > { %p627_p10 = pnand %p626_p9, %p620_p2 }
  0x2f   : > { %630 = shalt.err (!%p627_p10)
}
  0x30   : > { %521 = dma.hbm_to_vmem [thread:$0]  (!%p804_p7), %s178_s22, 128, %s181_s24, %s167_s27  }
  0x31   : > { %189 = sbr.rel (%p756_p5) target bundleno = 95 (0x5f), region = 32  ;;  %s191_s5 = sand.u32 (!%p756_p5), 1, %s673_s13  }
  0x32   : > { %s476_s6 = sshll.u32 (!%p756_p5), %s191_s5, 3  ;;  %s192_s7 = scalar_lea.sflag (!%p756_p5), [#allocation3], %s191_s5 }
  0x33   : > { %s195_s8 = scalar_lea.vmem (!%p756_p5), [#allocation2], %s476_s6 }
  0x36   : > { %656 = dma.done.wait (%p752_p4), %s192_s7, 128  }
  0x37   : > { %658 = vsyncadd (%p752_p4), %s192_s7, 4294967168 }
  0x38   : > { %660 = dma.done.wait (%p744_p1), [#allocation4], 64  }
  0x39   : > { %662 = vsyncadd (%p744_p1), [#allocation4], 4294967232 }
  0x3a   : > { %664 = dma.done.wait (%p744_p1), [#allocation5], 16  }
  0x3b   : > { %666 = vsyncadd (%p744_p1), [#allocation5], 4294967280 }
  0x3c   : > { %208 = sfence }
  0x3d   : > { %s249_s21 = sld [smem:[#allocation6]]  ;;  %v242_v0 = vld [vmem:[%s195_s8] ss:$4 sm:$0x3]  ;;  %v304_v11 = vlaneseq  ;;  %p233_p1 = scmp.lt.s32.totalorder %s681_s15, 1  ;;  %vm336_vm0 = vcmask 1040384  }
  0x3e   : > { %s484_s10 = sld [smem:[#allocation6 + $0x1]]  ;;  %v481_v2 = vld [vmem:[%s195_s8 + $0x1] ss:$4 sm:$0x3]  ;;  %vm339_vm1 = vcmask 1041408  }
  0x3f   : > { %s485_s11 = sld [smem:[#allocation6 + $0x2]]  ;;  %v482_v3 = vld [vmem:[%s195_s8 + $0x2] ss:$4 sm:$0x3]  ;;  %v305_v20 = vshrl.u32 %v304_v11, 7  ;;  %s874_s15 = smov (!%p233_p1, %s681_s15), 1 }
  0x40   : > { %s486_s12 = sld [smem:[#allocation6 + $0x3]]  ;;  %v483_v5 = vld [vmem:[%s195_s8 + $0x3] ss:$4 sm:$0x3]  ;;  %s500_s4 = sshll.u32 %s874_s15, 3 }
  0x41   : > { %s827_s20 = sld [smem:[#allocation7]]  ;;  %v306_v31 = vsub.s32 0, %v305_v20  ;;  %v310_v39 = vsub.s32 1, %v305_v20  ;;  %s240_s7 = scalar_lea.vmem %s859_s3, %s500_s4 }
  0x42   : > { %s487_s18 = sld [smem:[#allocation6 + $0x80]] }
  0x43   : > { %v250_v1 = vstv %s249_s21  ;;  %s488_s22 = sld [smem:[#allocation6 + $0x81]] }
  0x44   : > { %v251_v4 = vmul.f32 %v250_v1, %v242_v0  ;;  %v253_v6 = vstv %s484_s10  ;;  %s489_s23 = sld [smem:[#allocation6 + $0x82]] }
  0x45   : > { %v254_v7 = vmul.f32 %v481_v2, %v253_v6  ;;  %v257_v8 = vstv %s485_s11  ;;  %s490_s19 = sld [smem:[#allocation6 + $0x83]] }
  0x46   : > { %v258_v9 = vmul.f32 %v482_v3, %v257_v8  ;;  %v261_v10 = vstv %s486_s12  ;;  %s829_s24 = sld [smem:[#allocation7 + $0x1]] }
  0x47   : > { %v255_v12 = vadd.f32 %v254_v7, %v251_v4  ;;  %v262_v13 = vmul.f32 %v483_v5, %v261_v10  ;;  %s492_s25 = sld [smem:[#allocation6 + $0x100]]  ;;  %v265_v24 = vstv %s827_s20 }
  0x48   : > { %v268_v14 = vstv %s487_s18  ;;  %s493_s27 = sld [smem:[#allocation6 + $0x101]] }
  0x49   : > { %v259_v15 = vadd.f32 %v258_v9, %v255_v12  ;;  %v269_v16 = vmul.f32 %v268_v14, %v242_v0  ;;  %v271_v17 = vstv %s488_s22  ;;  %s494_s28 = sld [smem:[#allocation6 + $0x102]] }
  0x4a   : > { %v272_v18 = vmul.f32 %v481_v2, %v271_v17  ;;  %v275_v19 = vstv %s489_s23  ;;  %s495_s29 = sld [smem:[#allocation6 + $0x103]] }
  0x4b   : > { %v263_v21 = vadd.f32 %v262_v13, %v259_v15  ;;  %v276_v22 = vmul.f32 %v482_v3, %v275_v19  ;;  %v279_v23 = vstv %s490_s19  ;;  %s496_s30 = sld [smem:[#allocation7 + $0x2]] }
  0x4c   : > { %v273_v25 = vadd.f32 %v272_v18, %v269_v16  ;;  %v280_v26 = vmul.f32 %v483_v5, %v279_v23  ;;  %v283_v33 = vstv %s829_s24 }
  0x4d   : > { %v286_v27 = vstv %s492_s25  ;;  %v266_v32 = vadd.f32 %v265_v24, %v263_v21 }
  0x4e   : > { %v277_v28 = vadd.f32 %v276_v22, %v273_v25  ;;  %v287_v29 = vmul.f32 %v286_v27, %v242_v0  ;;  %v289_v30 = vstv %s493_s27 }
  0x4f   : > { %v290_v34 = vmul.f32 %v481_v2, %v289_v30  ;;  %v293_v35 = vstv %s494_s28  ;;  %v307_v44 = vrot.slane %v266_v32, %v306_v31  ;;  %v311_v46 = vrot.slane %v266_v32, %v310_v39 }
  0x50   : > { %v281_v36 = vadd.f32 %v280_v26, %v277_v28  ;;  %v294_v37 = vmul.f32 %v482_v3, %v293_v35  ;;  %v297_v38 = vstv %s495_s29 }
  0x51   : > { %v291_v40 = vadd.f32 %v290_v34, %v287_v29  ;;  %v298_v41 = vmul.f32 %v483_v5, %v297_v38  ;;  %v301_v45 = vstv %s496_s30 }
  0x52   : > { %v284_v42 = vadd.f32 %v283_v33, %v281_v36 }
  0x53   : > { %v295_v43 = vadd.f32 %v294_v37, %v291_v40 }
  0x54   : > { %v318_v47 = vrot.slane %v284_v42, %v306_v31  ;;  %v322_v48 = vrot.slane %v284_v42, %v310_v39 }
  0x55   : > { %v299_v49 = vadd.f32 %v298_v41, %v295_v43 }
  0x56   : > { %v337_v51 = vsel %vm336_vm0, %v307_v44, %v318_v47  ;;  %v338_v52 = vsel %vm336_vm0, %v311_v46, %v322_v48 }
  0x57   : > { %v302_v50 = vadd.f32 %v301_v45, %v299_v49 }
  0x59   : > { %v329_v53 = vrot.slane %v302_v50, %v306_v31  ;;  %v333_v54 = vrot.slane %v302_v50, %v310_v39 }
  0x5b   : > { %v340_v55 = vsel %vm339_vm1, %v337_v51, %v329_v53  ;;  %v341_v56 = vsel %vm339_vm1, %v338_v52, %v333_v54 }
  0x5c   : > { %v344_v57 = vcombine.low %v340_v55, %v341_v56 }
  0x5e   : > { %346 = vst [vmem:[%s240_s7] sm:$0x77] %v344_v57 }
  0x5f PF: > { %s18_s17 = sadd.s32 1, %s689_s17   ;;  %s866_s12 = smov %s673_s13 }
  0x60   : > { %p15_p4 = scmp.ge.s32.totalorder %s18_s17, 4   ;;  %s867_s13 = smov %s677_s14 }
  0x61   : > { %s868_s14 = smov %s798_s9  ;;  %s869_s15 = smov %s685_s16 }
  0x62   : > { %s870_s16 = smov %s872_s26  ;;  %17 = sbr.rel (!%p15_p4) target bundleno = 6 (0x6), region = 85 }
  0x67   :  { %377 = vsyncpa [#allocation3], 1 }
  0x68   :  { %379 = vsyncpa [#allocation3 + $0x1], 1 }
  0x69   :  { %380 = vsyncpa [#allocation4], 1 }
  0x6a   :  { %382 = vsyncpa [#allocation4 + $0x1], 1 }
  0x6b   :  { %383 = vsyncpa [#allocation5], 1 }
  0x6c   :  { %385 = vsyncpa [#allocation5 + $0x1], 1 }

</bundles_post_ra>
